<compile_context>
chip_gen: v6e
topology: v6e:2x2x1
jax: 0.10.0
libtpu: 0.0.40
codegen_flags: <defaults>
</compile_context>

<pallas_src>
import functools
import math

import jax
import jax.numpy as jnp
import numpy as np
from jax.experimental import pallas as pl
from jax.experimental.pallas import tpu as pltpu


def chunk_idxs_by_size(size, chunk_size):
    idxs = list(range(0, size + 1, chunk_size))
    if idxs[-1] != size:
        idxs.append(size)
    return list(zip(idxs[:-1], idxs[1:]))


def _round_up(x, m):
    return ((x + m - 1) // m) * m


def _pooled_extent(n, pool, stride):
    # PyTorch avg_pool2d ceil_mode=True, padding=0 (stride <= pool here, so the
    # last window always starts inside the input).
    return int(math.ceil(max(n - pool, 0) / stride)) + 1


def _coatesng_kernel(patch_ref, w_ref, out_ref, *, bias, Ho, Wo, Po, Pw,
                     pool, stride, PoPw_p):
    """One (batch element, filter tile) per grid step.

    patch_ref: (HoWo_p, Kp)     bf16 im2col patches (rows & K zero-padded)
    w_ref    : (Kp, TF)         bf16 filter tile
    out_ref  : (2, PoPw_p, TF)  f32; [0]=pooled relu(conv-b), [1]=pooled relu(-conv-b)
    """
    TF = w_ref.shape[1]
    # Conv: single MXU matmul, f32 accumulation.
    conv = jnp.dot(patch_ref[...], w_ref[...],
                   preferred_element_type=jnp.float32)            # (HoWo_p, TF)
    # Both signs side by side along lanes -> every pooling op below is
    # 2*TF lanes wide; stays in f32 on the VPU.
    act = jnp.concatenate(
        [jnp.maximum(conv - bias, 0.0), jnp.maximum(-conv - bias, 0.0)],
        axis=1)                                                    # (HoWo_p, 2*TF)

    # Ceil-mode average pooling with clipped divisors, entirely on the VPU:
    # static contiguous slices + adds, per-window 1/count is a trace-time float.
    rows = []
    for po in range(Po):
        rs = po * stride
        re = min(rs + pool, Ho)
        rowsum = act[rs * Wo:(rs + 1) * Wo, :]                     # (Wo, 2*TF)
        for r in range(rs + 1, re):
            rowsum = rowsum + act[r * Wo:(r + 1) * Wo, :]
        for pw in range(Pw):
            cs = pw * stride
            ce = min(cs + pool, Wo)
            win = rowsum[cs:cs + 1, :]                             # (1, 2*TF)
            for c in range(cs + 1, ce):
                win = win + rowsum[c:c + 1, :]
            rows.append(win * (1.0 / float((re - rs) * (ce - cs))))
    if PoPw_p > Po * Pw:
        rows.append(jnp.zeros((PoPw_p - Po * Pw, 2 * TF), jnp.float32))
    pooled = jnp.concatenate(rows, axis=0)                         # (PoPw_p, 2*TF)

    # Two dense, tile-aligned stores (PoPw_p multiple of 8, TF multiple of 128).
    out_ref[0] = pooled[:, :TF]
    out_ref[1] = pooled[:, TF:]


def _im2col(x, P):
    """x: (N, C, H, W) -> (N, Ho*Wo, C*P*P), patch element order (c, di, dj)."""
    N, C, H, W = x.shape
    Ho, Wo = H - P + 1, W - P + 1
    rows = []
    for di in range(P):
        cols = [x[:, :, di:di + Ho, dj:dj + Wo] for dj in range(P)]
        rows.append(jnp.stack(cols, axis=-1))                      # (N,C,Ho,Wo,P)
    patches = jnp.stack(rows, axis=-2)                             # (N,C,Ho,Wo,P,P)
    patches = jnp.transpose(patches, (0, 2, 3, 1, 4, 5))           # (N,Ho,Wo,C,P,P)
    return patches.reshape(N, Ho * Wo, C * P * P)


def _forward_partial_channels_last(x, filt, bias, pool, stride):
    """x: (N,C,H,W) f32, filt: (F,C,P,P) f32 -> (N, 2, Po, Pw, F) f32."""
    N, C, H, W = x.shape
    F_, _, P, _ = filt.shape
    Ho, Wo = H - P + 1, W - P + 1
    Po = _pooled_extent(Ho, pool, stride)
    Pw = _pooled_extent(Wo, pool, stride)

    K = C * P * P
    Kp = _round_up(K, 128)                    # MXU-friendly contracting dim
    Fp = _round_up(F_, 128)                   # lane-dense filter dim
    if Fp <= 512:
        TF = Fp
    elif Fp % 512 == 0:
        TF = 512
    elif Fp % 256 == 0:
        TF = 256
    else:
        TF = 128
    n_ft = Fp // TF

    HoWo, PoPw = Ho * Wo, Po * Pw
    HoWo_p = _round_up(HoWo, 8)               # sublane-aligned patch rows
    PoPw_p = _round_up(PoPw, 8)               # sublane-aligned pooled rows

    # im2col on host/XLA, pad rows + K, cast to bf16 (halves HBM traffic).
    patches = _im2col(x.astype(jnp.float32), P)                    # (N, HoWo, K)
    patches = jnp.pad(patches,
                      ((0, 0), (0, HoWo_p - HoWo), (0, Kp - K))).astype(jnp.bfloat16)

    w = filt.astype(jnp.float32).reshape(F_, K).T                  # (K, F)
    w = jnp.pad(w, ((0, Kp - K), (0, Fp - F_))).astype(jnp.bfloat16)   # (Kp, Fp)

    kern = functools.partial(_coatesng_kernel, bias=float(bias), Ho=Ho, Wo=Wo,
                             Po=Po, Pw=Pw, pool=pool, stride=stride,
                             PoPw_p=PoPw_p)

    # Per-grid-step VMEM footprint -> explicit scoped-vmem limit (<< 64 MiB so
    # the same tiling also fits v7x's smaller physical VMEM).
    est = (HoWo_p * Kp * 2 * 2                # patches, bf16, double buffered
           + Kp * TF * 2 * 2                  # weight tile, bf16, double buffered
           + 2 * PoPw_p * TF * 4 * 2          # output tile, f32, double buffered
           + 6 * HoWo_p * 2 * TF * 4)         # f32 conv/act/pooling intermediates
    vmem_limit = int(min(max(2 * est, 32 * 2 ** 20), 56 * 2 ** 20))

    out = pl.pallas_call(
        kern,
        out_shape=jax.ShapeDtypeStruct((N, 2, PoPw_p, Fp), jnp.float32),
        grid_spec=pltpu.PrefetchScalarGridSpec(
            num_scalar_prefetch=0,
            grid=(N, n_ft),
            in_specs=[
                pl.BlockSpec((None, HoWo_p, Kp), lambda n, f: (n, 0, 0)),
                pl.BlockSpec((Kp, TF), lambda n, f: (0, f)),
            ],
            out_specs=pl.BlockSpec((None, 2, PoPw_p, TF),
                                   lambda n, f: (n, 0, 0, f)),
        ),
        compiler_params=pltpu.CompilerParams(
            dimension_semantics=("parallel", "parallel"),
            vmem_limit_bytes=vmem_limit),
    )(patches, w)

    # Drop sublane / filter padding; stay channels-last (lane-dense) here.
    out = out[:, :, :PoPw, :F_]
    return out.reshape(N, 2, Po, Pw, F_)


def _channels_last_to_nchw(t):
    """(N, 2, Po, Pw, F) -> (N, 2F, Po, Pw), matching torch.cat((pos, neg), dim=1)."""
    N, two, Po, Pw, F_ = t.shape
    return t.transpose(0, 1, 4, 2, 3).reshape(N, two * F_, Po, Pw)


class BasicCoatesNgNetPallas:
    """JAX/Pallas port of BasicCoatesNgNet.forward (NCHW in / NCHW out)."""

    def __init__(self, filters, patch_size=6, in_channels=3, pool_size=2,
                 pool_stride=2, bias=1.0, filter_batch_size=1024):
        self.filters = np.asarray(filters, dtype=np.float32).copy()
        self.patch_size = patch_size
        self.in_channels = in_channels
        self.pool_size = pool_size
        self.pool_stride = pool_stride
        self.bias = bias
        self.filter_batch_size = filter_batch_size

    def _forward_partial_cl(self, x, start, end):
        filt = jnp.asarray(self.filters[start:end])
        return _forward_partial_channels_last(x, filt, self.bias,
                                              self.pool_size, self.pool_stride)

    def forward_partial(self, x, start, end):
        return _channels_last_to_nchw(self._forward_partial_cl(x, start, end))

    def forward(self, x):
        num_filters = self.filters.shape[0]
        # Deferred re-layout: kernels emit channels-last chunks; the NCHW
        # conversion happens once, after all kernels, preserving torch's
        # [chunk0_pos, chunk0_neg, chunk1_pos, ...] channel order.
        chunks = [self._forward_partial_cl(x, s, e)
                  for s, e in chunk_idxs_by_size(num_filters,
                                                 self.filter_batch_size)]
        return jnp.concatenate([_channels_last_to_nchw(c) for c in chunks],
                               axis=1)


def _reference(x, filters, bias, pool, stride):
    """Pure JAX/numpy reference (single filter chunk)."""
    conv = np.asarray(jax.lax.conv_general_dilated(
        jnp.asarray(x), jnp.asarray(filters), window_strides=(1, 1),
        padding="VALID", dimension_numbers=("NCHW", "OIHW", "NCHW")))
    pos = np.maximum(conv - bias, 0.0)
    neg = np.maximum(-conv - bias, 0.0)

    def pool_np(a):
        N, F_, H, W = a.shape
        Po = _pooled_extent(H, pool, stride)
        Pw = _pooled_extent(W, pool, stride)
        out = np.zeros((N, F_, Po, Pw), np.float32)
        for i in range(Po):
            for j in range(Pw):
                hs, he = i * stride, min(i * stride + pool, H)
                ws, we = j * stride, min(j * stride + pool, W)
                out[:, :, i, j] = a[:, :, hs:he, ws:we].mean(axis=(2, 3))
        return out

    return np.concatenate([pool_np(pos), pool_np(neg)], axis=1)


if __name__ == "__main__":
    key = jax.random.PRNGKey(0)
    kx, kf = jax.random.split(key)

    N, C, H, W = 2, 3, 16, 16
    F_, P = 8, 6

    x = jax.random.normal(kx, (N, C, H, W), dtype=jnp.float32)
    filters = jax.random.normal(kf, (F_, C, P, P), dtype=jnp.float32)

    net = BasicCoatesNgNetPallas(np.asarray(filters), patch_size=P,
                                 in_channels=C, pool_size=2, pool_stride=2,
                                 bias=1.0, filter_batch_size=1024)

    out = net.forward(x)
    out = jax.block_until_ready(out)

    ref = _reference(np.asarray(x), np.asarray(filters), 1.0, 2, 2)
    assert out.shape == ref.shape, (out.shape, ref.shape)
    # bf16 matmul inputs (f32 accumulation): slightly wider absolute slack for
    # values that land right at the ReLU threshold.
    np.testing.assert_allclose(np.asarray(out), ref, rtol=2e-2, atol=1e-1)

    print("KERNEL_OK")
</pallas_src>

<mosaic_0001>
module attributes {stable_mosaic.version = 11 : i64} {
  func.func @_coatesng_kernel(%arg0: i32, %arg1: i32, %arg2: memref<1x128x128xbf16, #tpu.memory_space<vmem>>, %arg3: memref<128x128xbf16, #tpu.memory_space<vmem>>, %arg4: memref<1x2x40x128xf32, #tpu.memory_space<vmem>>) attributes {dimension_semantics = [#tpu.dimension_semantics<parallel>, #tpu.dimension_semantics<parallel>], iteration_bounds = array<i64: 2, 1>, scalar_prefetch = 0 : i64, scratch_operands = 0 : i64, tpu.core_type = #tpu.core_type<tc>, window_params = [{transform_indices = @transform_0, window_bounds = array<i64: 1, 128, 128>}, {transform_indices = @transform_1, window_bounds = array<i64: 128, 128>}, {transform_indices = @transform_2, window_bounds = array<i64: 1, 2, 40, 128>}]} {
    %c0 = arith.constant 0 : index
    %c0_0 = arith.constant 0 : index
    %c0_1 = arith.constant 0 : index
    %0 = vector.load %arg2[%c0, %c0_0, %c0_1] : memref<1x128x128xbf16, #tpu.memory_space<vmem>>, vector<1x128x128xbf16>
    %1 = vector.shape_cast %0 : vector<1x128x128xbf16> to vector<128x128xbf16>
    %c0_2 = arith.constant 0 : index
    %c0_3 = arith.constant 0 : index
    %2 = vector.load %arg3[%c0_2, %c0_3] : memref<128x128xbf16, #tpu.memory_space<vmem>>, vector<128x128xbf16>
    %cst = arith.constant dense<0.000000e+00> : vector<128x128xf32>
    %3 = tpu.matmul %1, %2, %cst {dimension_numbers = #tpu.dot_dimension_numbers<[1], [0], [0], [1], [0, 0, 1, 1], [], []>} : vector<128x128xbf16>, vector<128x128xbf16>, vector<128x128xf32> -> vector<128x128xf32>
    %cst_4 = arith.constant 1.000000e+00 : f32
    %4 = vector.broadcast %cst_4 : f32 to vector<128x128xf32>
    %5 = arith.subf %3, %4 : vector<128x128xf32>
    %cst_5 = arith.constant 0.000000e+00 : f32
    %6 = vector.broadcast %cst_5 : f32 to vector<128x128xf32>
    %7 = arith.maximumf %5, %6 : vector<128x128xf32>
    %cst_6 = arith.constant 0.000000e+00 : f32
    %8 = vector.broadcast %cst_6 : f32 to vector<128x128xf32>
    %9 = arith.subf %8, %3 : vector<128x128xf32>
    %cst_7 = arith.constant 1.000000e+00 : f32
    %10 = vector.broadcast %cst_7 : f32 to vector<128x128xf32>
    %11 = arith.subf %9, %10 : vector<128x128xf32>
    %cst_8 = arith.constant 0.000000e+00 : f32
    %12 = vector.broadcast %cst_8 : f32 to vector<128x128xf32>
    %13 = arith.maximumf %11, %12 : vector<128x128xf32>
    %14 = tpu.concatenate %7, %13 in 1 : vector<128x128xf32>, vector<128x128xf32> -> vector<128x256xf32>
    %15 = vector.extract_strided_slice %14 {offsets = [0, 0], sizes = [11, 256], strides = [1, 1]} : vector<128x256xf32> to vector<11x256xf32>
    %16 = vector.extract_strided_slice %14 {offsets = [11, 0], sizes = [11, 256], strides = [1, 1]} : vector<128x256xf32> to vector<11x256xf32>
    %17 = arith.addf %15, %16 : vector<11x256xf32>
    %18 = vector.extract_strided_slice %17 {offsets = [0, 0], sizes = [1, 256], strides = [1, 1]} : vector<11x256xf32> to vector<1x256xf32>
    %19 = vector.extract_strided_slice %17 {offsets = [1, 0], sizes = [1, 256], strides = [1, 1]} : vector<11x256xf32> to vector<1x256xf32>
    %20 = arith.addf %18, %19 : vector<1x256xf32>
    %cst_9 = arith.constant 2.500000e-01 : f32
    %21 = vector.broadcast %cst_9 : f32 to vector<1x256xf32>
    %22 = arith.mulf %20, %21 : vector<1x256xf32>
    %23 = vector.extract_strided_slice %17 {offsets = [2, 0], sizes = [1, 256], strides = [1, 1]} : vector<11x256xf32> to vector<1x256xf32>
    %24 = vector.extract_strided_slice %17 {offsets = [3, 0], sizes = [1, 256], strides = [1, 1]} : vector<11x256xf32> to vector<1x256xf32>
    %25 = arith.addf %23, %24 : vector<1x256xf32>
    %cst_10 = arith.constant 2.500000e-01 : f32
    %26 = vector.broadcast %cst_10 : f32 to vector<1x256xf32>
    %27 = arith.mulf %25, %26 : vector<1x256xf32>
    %28 = vector.extract_strided_slice %17 {offsets = [4, 0], sizes = [1, 256], strides = [1, 1]} : vector<11x256xf32> to vector<1x256xf32>
    %29 = vector.extract_strided_slice %17 {offsets = [5, 0], sizes = [1, 256], strides = [1, 1]} : vector<11x256xf32> to vector<1x256xf32>
    %30 = arith.addf %28, %29 : vector<1x256xf32>
    %cst_11 = arith.constant 2.500000e-01 : f32
    %31 = vector.broadcast %cst_11 : f32 to vector<1x256xf32>
    %32 = arith.mulf %30, %31 : vector<1x256xf32>
    %33 = vector.extract_strided_slice %17 {offsets = [6, 0], sizes = [1, 256], strides = [1, 1]} : vector<11x256xf32> to vector<1x256xf32>
    %34 = vector.extract_strided_slice %17 {offsets = [7, 0], sizes = [1, 256], strides = [1, 1]} : vector<11x256xf32> to vector<1x256xf32>
    %35 = arith.addf %33, %34 : vector<1x256xf32>
    %cst_12 = arith.constant 2.500000e-01 : f32
    %36 = vector.broadcast %cst_12 : f32 to vector<1x256xf32>
    %37 = arith.mulf %35, %36 : vector<1x256xf32>
    %38 = vector.extract_strided_slice %17 {offsets = [8, 0], sizes = [1, 256], strides = [1, 1]} : vector<11x256xf32> to vector<1x256xf32>
    %39 = vector.extract_strided_slice %17 {offsets = [9, 0], sizes = [1, 256], strides = [1, 1]} : vector<11x256xf32> to vector<1x256xf32>
    %40 = arith.addf %38, %39 : vector<1x256xf32>
    %cst_13 = arith.constant 2.500000e-01 : f32
    %41 = vector.broadcast %cst_13 : f32 to vector<1x256xf32>
    %42 = arith.mulf %40, %41 : vector<1x256xf32>
    %43 = vector.extract_strided_slice %17 {offsets = [10, 0], sizes = [1, 256], strides = [1, 1]} : vector<11x256xf32> to vector<1x256xf32>
    %cst_14 = arith.constant 5.000000e-01 : f32
    %44 = vector.broadcast %cst_14 : f32 to vector<1x256xf32>
    %45 = arith.mulf %43, %44 : vector<1x256xf32>
    %46 = vector.extract_strided_slice %14 {offsets = [22, 0], sizes = [11, 256], strides = [1, 1]} : vector<128x256xf32> to vector<11x256xf32>
    %47 = vector.extract_strided_slice %14 {offsets = [33, 0], sizes = [11, 256], strides = [1, 1]} : vector<128x256xf32> to vector<11x256xf32>
    %48 = arith.addf %46, %47 : vector<11x256xf32>
    %49 = vector.extract_strided_slice %48 {offsets = [0, 0], sizes = [1, 256], strides = [1, 1]} : vector<11x256xf32> to vector<1x256xf32>
    %50 = vector.extract_strided_slice %48 {offsets = [1, 0], sizes = [1, 256], strides = [1, 1]} : vector<11x256xf32> to vector<1x256xf32>
    %51 = arith.addf %49, %50 : vector<1x256xf32>
    %cst_15 = arith.constant 2.500000e-01 : f32
    %52 = vector.broadcast %cst_15 : f32 to vector<1x256xf32>
    %53 = arith.mulf %51, %52 : vector<1x256xf32>
    %54 = vector.extract_strided_slice %48 {offsets = [2, 0], sizes = [1, 256], strides = [1, 1]} : vector<11x256xf32> to vector<1x256xf32>
    %55 = vector.extract_strided_slice %48 {offsets = [3, 0], sizes = [1, 256], strides = [1, 1]} : vector<11x256xf32> to vector<1x256xf32>
    %56 = arith.addf %54, %55 : vector<1x256xf32>
    %cst_16 = arith.constant 2.500000e-01 : f32
    %57 = vector.broadcast %cst_16 : f32 to vector<1x256xf32>
    %58 = arith.mulf %56, %57 : vector<1x256xf32>
    %59 = vector.extract_strided_slice %48 {offsets = [4, 0], sizes = [1, 256], strides = [1, 1]} : vector<11x256xf32> to vector<1x256xf32>
    %60 = vector.extract_strided_slice %48 {offsets = [5, 0], sizes = [1, 256], strides = [1, 1]} : vector<11x256xf32> to vector<1x256xf32>
    %61 = arith.addf %59, %60 : vector<1x256xf32>
    %cst_17 = arith.constant 2.500000e-01 : f32
    %62 = vector.broadcast %cst_17 : f32 to vector<1x256xf32>
    %63 = arith.mulf %61, %62 : vector<1x256xf32>
    %64 = vector.extract_strided_slice %48 {offsets = [6, 0], sizes = [1, 256], strides = [1, 1]} : vector<11x256xf32> to vector<1x256xf32>
    %65 = vector.extract_strided_slice %48 {offsets = [7, 0], sizes = [1, 256], strides = [1, 1]} : vector<11x256xf32> to vector<1x256xf32>
    %66 = arith.addf %64, %65 : vector<1x256xf32>
    %cst_18 = arith.constant 2.500000e-01 : f32
    %67 = vector.broadcast %cst_18 : f32 to vector<1x256xf32>
    %68 = arith.mulf %66, %67 : vector<1x256xf32>
    %69 = vector.extract_strided_slice %48 {offsets = [8, 0], sizes = [1, 256], strides = [1, 1]} : vector<11x256xf32> to vector<1x256xf32>
    %70 = vector.extract_strided_slice %48 {offsets = [9, 0], sizes = [1, 256], strides = [1, 1]} : vector<11x256xf32> to vector<1x256xf32>
    %71 = arith.addf %69, %70 : vector<1x256xf32>
    %cst_19 = arith.constant 2.500000e-01 : f32
    %72 = vector.broadcast %cst_19 : f32 to vector<1x256xf32>
    %73 = arith.mulf %71, %72 : vector<1x256xf32>
    %74 = vector.extract_strided_slice %48 {offsets = [10, 0], sizes = [1, 256], strides = [1, 1]} : vector<11x256xf32> to vector<1x256xf32>
    %cst_20 = arith.constant 5.000000e-01 : f32
    %75 = vector.broadcast %cst_20 : f32 to vector<1x256xf32>
    %76 = arith.mulf %74, %75 : vector<1x256xf32>
    %77 = vector.extract_strided_slice %14 {offsets = [44, 0], sizes = [11, 256], strides = [1, 1]} : vector<128x256xf32> to vector<11x256xf32>
    %78 = vector.extract_strided_slice %14 {offsets = [55, 0], sizes = [11, 256], strides = [1, 1]} : vector<128x256xf32> to vector<11x256xf32>
    %79 = arith.addf %77, %78 : vector<11x256xf32>
    %80 = vector.extract_strided_slice %79 {offsets = [0, 0], sizes = [1, 256], strides = [1, 1]} : vector<11x256xf32> to vector<1x256xf32>
    %81 = vector.extract_strided_slice %79 {offsets = [1, 0], sizes = [1, 256], strides = [1, 1]} : vector<11x256xf32> to vector<1x256xf32>
    %82 = arith.addf %80, %81 : vector<1x256xf32>
    %cst_21 = arith.constant 2.500000e-01 : f32
    %83 = vector.broadcast %cst_21 : f32 to vector<1x256xf32>
    %84 = arith.mulf %82, %83 : vector<1x256xf32>
    %85 = vector.extract_strided_slice %79 {offsets = [2, 0], sizes = [1, 256], strides = [1, 1]} : vector<11x256xf32> to vector<1x256xf32>
    %86 = vector.extract_strided_slice %79 {offsets = [3, 0], sizes = [1, 256], strides = [1, 1]} : vector<11x256xf32> to vector<1x256xf32>
    %87 = arith.addf %85, %86 : vector<1x256xf32>
    %cst_22 = arith.constant 2.500000e-01 : f32
    %88 = vector.broadcast %cst_22 : f32 to vector<1x256xf32>
    %89 = arith.mulf %87, %88 : vector<1x256xf32>
    %90 = vector.extract_strided_slice %79 {offsets = [4, 0], sizes = [1, 256], strides = [1, 1]} : vector<11x256xf32> to vector<1x256xf32>
    %91 = vector.extract_strided_slice %79 {offsets = [5, 0], sizes = [1, 256], strides = [1, 1]} : vector<11x256xf32> to vector<1x256xf32>
    %92 = arith.addf %90, %91 : vector<1x256xf32>
    %cst_23 = arith.constant 2.500000e-01 : f32
    %93 = vector.broadcast %cst_23 : f32 to vector<1x256xf32>
    %94 = arith.mulf %92, %93 : vector<1x256xf32>
    %95 = vector.extract_strided_slice %79 {offsets = [6, 0], sizes = [1, 256], strides = [1, 1]} : vector<11x256xf32> to vector<1x256xf32>
    %96 = vector.extract_strided_slice %79 {offsets = [7, 0], sizes = [1, 256], strides = [1, 1]} : vector<11x256xf32> to vector<1x256xf32>
    %97 = arith.addf %95, %96 : vector<1x256xf32>
    %cst_24 = arith.constant 2.500000e-01 : f32
    %98 = vector.broadcast %cst_24 : f32 to vector<1x256xf32>
    %99 = arith.mulf %97, %98 : vector<1x256xf32>
    %100 = vector.extract_strided_slice %79 {offsets = [8, 0], sizes = [1, 256], strides = [1, 1]} : vector<11x256xf32> to vector<1x256xf32>
    %101 = vector.extract_strided_slice %79 {offsets = [9, 0], sizes = [1, 256], strides = [1, 1]} : vector<11x256xf32> to vector<1x256xf32>
    %102 = arith.addf %100, %101 : vector<1x256xf32>
    %cst_25 = arith.constant 2.500000e-01 : f32
    %103 = vector.broadcast %cst_25 : f32 to vector<1x256xf32>
    %104 = arith.mulf %102, %103 : vector<1x256xf32>
    %105 = vector.extract_strided_slice %79 {offsets = [10, 0], sizes = [1, 256], strides = [1, 1]} : vector<11x256xf32> to vector<1x256xf32>
    %cst_26 = arith.constant 5.000000e-01 : f32
    %106 = vector.broadcast %cst_26 : f32 to vector<1x256xf32>
    %107 = arith.mulf %105, %106 : vector<1x256xf32>
    %108 = vector.extract_strided_slice %14 {offsets = [66, 0], sizes = [11, 256], strides = [1, 1]} : vector<128x256xf32> to vector<11x256xf32>
    %109 = vector.extract_strided_slice %14 {offsets = [77, 0], sizes = [11, 256], strides = [1, 1]} : vector<128x256xf32> to vector<11x256xf32>
    %110 = arith.addf %108, %109 : vector<11x256xf32>
    %111 = vector.extract_strided_slice %110 {offsets = [0, 0], sizes = [1, 256], strides = [1, 1]} : vector<11x256xf32> to vector<1x256xf32>
    %112 = vector.extract_strided_slice %110 {offsets = [1, 0], sizes = [1, 256], strides = [1, 1]} : vector<11x256xf32> to vector<1x256xf32>
    %113 = arith.addf %111, %112 : vector<1x256xf32>
    %cst_27 = arith.constant 2.500000e-01 : f32
    %114 = vector.broadcast %cst_27 : f32 to vector<1x256xf32>
    %115 = arith.mulf %113, %114 : vector<1x256xf32>
    %116 = vector.extract_strided_slice %110 {offsets = [2, 0], sizes = [1, 256], strides = [1, 1]} : vector<11x256xf32> to vector<1x256xf32>
    %117 = vector.extract_strided_slice %110 {offsets = [3, 0], sizes = [1, 256], strides = [1, 1]} : vector<11x256xf32> to vector<1x256xf32>
    %118 = arith.addf %116, %117 : vector<1x256xf32>
    %cst_28 = arith.constant 2.500000e-01 : f32
    %119 = vector.broadcast %cst_28 : f32 to vector<1x256xf32>
    %120 = arith.mulf %118, %119 : vector<1x256xf32>
    %121 = vector.extract_strided_slice %110 {offsets = [4, 0], sizes = [1, 256], strides = [1, 1]} : vector<11x256xf32> to vector<1x256xf32>
    %122 = vector.extract_strided_slice %110 {offsets = [5, 0], sizes = [1, 256], strides = [1, 1]} : vector<11x256xf32> to vector<1x256xf32>
    %123 = arith.addf %121, %122 : vector<1x256xf32>
    %cst_29 = arith.constant 2.500000e-01 : f32
    %124 = vector.broadcast %cst_29 : f32 to vector<1x256xf32>
    %125 = arith.mulf %123, %124 : vector<1x256xf32>
    %126 = vector.extract_strided_slice %110 {offsets = [6, 0], sizes = [1, 256], strides = [1, 1]} : vector<11x256xf32> to vector<1x256xf32>
    %127 = vector.extract_strided_slice %110 {offsets = [7, 0], sizes = [1, 256], strides = [1, 1]} : vector<11x256xf32> to vector<1x256xf32>
    %128 = arith.addf %126, %127 : vector<1x256xf32>
    %cst_30 = arith.constant 2.500000e-01 : f32
    %129 = vector.broadcast %cst_30 : f32 to vector<1x256xf32>
    %130 = arith.mulf %128, %129 : vector<1x256xf32>
    %131 = vector.extract_strided_slice %110 {offsets = [8, 0], sizes = [1, 256], strides = [1, 1]} : vector<11x256xf32> to vector<1x256xf32>
    %132 = vector.extract_strided_slice %110 {offsets = [9, 0], sizes = [1, 256], strides = [1, 1]} : vector<11x256xf32> to vector<1x256xf32>
    %133 = arith.addf %131, %132 : vector<1x256xf32>
    %cst_31 = arith.constant 2.500000e-01 : f32
    %134 = vector.broadcast %cst_31 : f32 to vector<1x256xf32>
    %135 = arith.mulf %133, %134 : vector<1x256xf32>
    %136 = vector.extract_strided_slice %110 {offsets = [10, 0], sizes = [1, 256], strides = [1, 1]} : vector<11x256xf32> to vector<1x256xf32>
    %cst_32 = arith.constant 5.000000e-01 : f32
    %137 = vector.broadcast %cst_32 : f32 to vector<1x256xf32>
    %138 = arith.mulf %136, %137 : vector<1x256xf32>
    %139 = vector.extract_strided_slice %14 {offsets = [88, 0], sizes = [11, 256], strides = [1, 1]} : vector<128x256xf32> to vector<11x256xf32>
    %140 = vector.extract_strided_slice %14 {offsets = [99, 0], sizes = [11, 256], strides = [1, 1]} : vector<128x256xf32> to vector<11x256xf32>
    %141 = arith.addf %139, %140 : vector<11x256xf32>
    %142 = vector.extract_strided_slice %141 {offsets = [0, 0], sizes = [1, 256], strides = [1, 1]} : vector<11x256xf32> to vector<1x256xf32>
    %143 = vector.extract_strided_slice %141 {offsets = [1, 0], sizes = [1, 256], strides = [1, 1]} : vector<11x256xf32> to vector<1x256xf32>
    %144 = arith.addf %142, %143 : vector<1x256xf32>
    %cst_33 = arith.constant 2.500000e-01 : f32
    %145 = vector.broadcast %cst_33 : f32 to vector<1x256xf32>
    %146 = arith.mulf %144, %145 : vector<1x256xf32>
    %147 = vector.extract_strided_slice %141 {offsets = [2, 0], sizes = [1, 256], strides = [1, 1]} : vector<11x256xf32> to vector<1x256xf32>
    %148 = vector.extract_strided_slice %141 {offsets = [3, 0], sizes = [1, 256], strides = [1, 1]} : vector<11x256xf32> to vector<1x256xf32>
    %149 = arith.addf %147, %148 : vector<1x256xf32>
    %cst_34 = arith.constant 2.500000e-01 : f32
    %150 = vector.broadcast %cst_34 : f32 to vector<1x256xf32>
    %151 = arith.mulf %149, %150 : vector<1x256xf32>
    %152 = vector.extract_strided_slice %141 {offsets = [4, 0], sizes = [1, 256], strides = [1, 1]} : vector<11x256xf32> to vector<1x256xf32>
    %153 = vector.extract_strided_slice %141 {offsets = [5, 0], sizes = [1, 256], strides = [1, 1]} : vector<11x256xf32> to vector<1x256xf32>
    %154 = arith.addf %152, %153 : vector<1x256xf32>
    %cst_35 = arith.constant 2.500000e-01 : f32
    %155 = vector.broadcast %cst_35 : f32 to vector<1x256xf32>
    %156 = arith.mulf %154, %155 : vector<1x256xf32>
    %157 = vector.extract_strided_slice %141 {offsets = [6, 0], sizes = [1, 256], strides = [1, 1]} : vector<11x256xf32> to vector<1x256xf32>
    %158 = vector.extract_strided_slice %141 {offsets = [7, 0], sizes = [1, 256], strides = [1, 1]} : vector<11x256xf32> to vector<1x256xf32>
    %159 = arith.addf %157, %158 : vector<1x256xf32>
    %cst_36 = arith.constant 2.500000e-01 : f32
    %160 = vector.broadcast %cst_36 : f32 to vector<1x256xf32>
    %161 = arith.mulf %159, %160 : vector<1x256xf32>
    %162 = vector.extract_strided_slice %141 {offsets = [8, 0], sizes = [1, 256], strides = [1, 1]} : vector<11x256xf32> to vector<1x256xf32>
    %163 = vector.extract_strided_slice %141 {offsets = [9, 0], sizes = [1, 256], strides = [1, 1]} : vector<11x256xf32> to vector<1x256xf32>
    %164 = arith.addf %162, %163 : vector<1x256xf32>
    %cst_37 = arith.constant 2.500000e-01 : f32
    %165 = vector.broadcast %cst_37 : f32 to vector<1x256xf32>
    %166 = arith.mulf %164, %165 : vector<1x256xf32>
    %167 = vector.extract_strided_slice %141 {offsets = [10, 0], sizes = [1, 256], strides = [1, 1]} : vector<11x256xf32> to vector<1x256xf32>
    %cst_38 = arith.constant 5.000000e-01 : f32
    %168 = vector.broadcast %cst_38 : f32 to vector<1x256xf32>
    %169 = arith.mulf %167, %168 : vector<1x256xf32>
    %170 = vector.extract_strided_slice %14 {offsets = [110, 0], sizes = [11, 256], strides = [1, 1]} : vector<128x256xf32> to vector<11x256xf32>
    %171 = vector.extract_strided_slice %170 {offsets = [0, 0], sizes = [1, 256], strides = [1, 1]} : vector<11x256xf32> to vector<1x256xf32>
    %172 = vector.extract_strided_slice %170 {offsets = [1, 0], sizes = [1, 256], strides = [1, 1]} : vector<11x256xf32> to vector<1x256xf32>
    %173 = arith.addf %171, %172 : vector<1x256xf32>
    %cst_39 = arith.constant 5.000000e-01 : f32
    %174 = vector.broadcast %cst_39 : f32 to vector<1x256xf32>
    %175 = arith.mulf %173, %174 : vector<1x256xf32>
    %176 = vector.extract_strided_slice %170 {offsets = [2, 0], sizes = [1, 256], strides = [1, 1]} : vector<11x256xf32> to vector<1x256xf32>
    %177 = vector.extract_strided_slice %170 {offsets = [3, 0], sizes = [1, 256], strides = [1, 1]} : vector<11x256xf32> to vector<1x256xf32>
    %178 = arith.addf %176, %177 : vector<1x256xf32>
    %cst_40 = arith.constant 5.000000e-01 : f32
    %179 = vector.broadcast %cst_40 : f32 to vector<1x256xf32>
    %180 = arith.mulf %178, %179 : vector<1x256xf32>
    %181 = vector.extract_strided_slice %170 {offsets = [4, 0], sizes = [1, 256], strides = [1, 1]} : vector<11x256xf32> to vector<1x256xf32>
    %182 = vector.extract_strided_slice %170 {offsets = [5, 0], sizes = [1, 256], strides = [1, 1]} : vector<11x256xf32> to vector<1x256xf32>
    %183 = arith.addf %181, %182 : vector<1x256xf32>
    %cst_41 = arith.constant 5.000000e-01 : f32
    %184 = vector.broadcast %cst_41 : f32 to vector<1x256xf32>
    %185 = arith.mulf %183, %184 : vector<1x256xf32>
    %186 = vector.extract_strided_slice %170 {offsets = [6, 0], sizes = [1, 256], strides = [1, 1]} : vector<11x256xf32> to vector<1x256xf32>
    %187 = vector.extract_strided_slice %170 {offsets = [7, 0], sizes = [1, 256], strides = [1, 1]} : vector<11x256xf32> to vector<1x256xf32>
    %188 = arith.addf %186, %187 : vector<1x256xf32>
    %cst_42 = arith.constant 5.000000e-01 : f32
    %189 = vector.broadcast %cst_42 : f32 to vector<1x256xf32>
    %190 = arith.mulf %188, %189 : vector<1x256xf32>
    %191 = vector.extract_strided_slice %170 {offsets = [8, 0], sizes = [1, 256], strides = [1, 1]} : vector<11x256xf32> to vector<1x256xf32>
    %192 = vector.extract_strided_slice %170 {offsets = [9, 0], sizes = [1, 256], strides = [1, 1]} : vector<11x256xf32> to vector<1x256xf32>
    %193 = arith.addf %191, %192 : vector<1x256xf32>
    %cst_43 = arith.constant 5.000000e-01 : f32
    %194 = vector.broadcast %cst_43 : f32 to vector<1x256xf32>
    %195 = arith.mulf %193, %194 : vector<1x256xf32>
    %196 = vector.extract_strided_slice %170 {offsets = [10, 0], sizes = [1, 256], strides = [1, 1]} : vector<11x256xf32> to vector<1x256xf32>
    %cst_44 = arith.constant 1.000000e+00 : f32
    %197 = vector.broadcast %cst_44 : f32 to vector<1x256xf32>
    %198 = arith.mulf %196, %197 : vector<1x256xf32>
    %cst_45 = arith.constant 0.000000e+00 : f32
    %199 = vector.broadcast %cst_45 : f32 to vector<4x256xf32>
    %200 = tpu.concatenate %22, %27, %32, %37, %42, %45, %53, %58, %63, %68, %73, %76, %84, %89, %94, %99 in 0 : vector<1x256xf32>, vector<1x256xf32>, vector<1x256xf32>, vector<1x256xf32>, vector<1x256xf32>, vector<1x256xf32>, vector<1x256xf32>, vector<1x256xf32>, vector<1x256xf32>, vector<1x256xf32>, vector<1x256xf32>, vector<1x256xf32>, vector<1x256xf32>, vector<1x256xf32>, vector<1x256xf32>, vector<1x256xf32> -> vector<16x256xf32>
    %201 = tpu.concatenate %104, %107, %115, %120, %125, %130, %135, %138, %146, %151, %156, %161, %166, %169, %175, %180 in 0 : vector<1x256xf32>, vector<1x256xf32>, vector<1x256xf32>, vector<1x256xf32>, vector<1x256xf32>, vector<1x256xf32>, vector<1x256xf32>, vector<1x256xf32>, vector<1x256xf32>, vector<1x256xf32>, vector<1x256xf32>, vector<1x256xf32>, vector<1x256xf32>, vector<1x256xf32>, vector<1x256xf32>, vector<1x256xf32> -> vector<16x256xf32>
    %202 = tpu.concatenate %185, %190, %195, %198, %199 in 0 : vector<1x256xf32>, vector<1x256xf32>, vector<1x256xf32>, vector<1x256xf32>, vector<4x256xf32> -> vector<8x256xf32>
    %203 = tpu.concatenate %200, %201, %202 in 0 : vector<16x256xf32>, vector<16x256xf32>, vector<8x256xf32> -> vector<40x256xf32>
    %204 = vector.extract_strided_slice %203 {offsets = [0, 0], sizes = [40, 128], strides = [1, 1]} : vector<40x256xf32> to vector<40x128xf32>
    %c0_46 = arith.constant 0 : index
    %c0_47 = arith.constant 0 : index
    %c0_48 = arith.constant 0 : index
    %c0_49 = arith.constant 0 : index
    %205 = vector.load %arg4[%c0_46, %c0_47, %c0_48, %c0_49] : memref<1x2x40x128xf32, #tpu.memory_space<vmem>>, vector<1x1x40x128xf32>
    %206 = vector.shape_cast %205 : vector<1x1x40x128xf32> to vector<40x128xf32>
    %207 = vector.shape_cast %204 : vector<40x128xf32> to vector<1x1x40x128xf32>
    tpu.vector_store %arg4[%c0_46, %c0_47, %c0_48, %c0_49], %207 {strides = array<i32>} : memref<1x2x40x128xf32, #tpu.memory_space<vmem>>, vector<1x1x40x128xf32>,
    %208 = vector.extract_strided_slice %203 {offsets = [0, 128], sizes = [40, 128], strides = [1, 1]} : vector<40x256xf32> to vector<40x128xf32>
    %c0_50 = arith.constant 0 : index
    %c1 = arith.constant 1 : index
    %c0_51 = arith.constant 0 : index
    %c0_52 = arith.constant 0 : index
    %209 = vector.load %arg4[%c0_50, %c1, %c0_51, %c0_52] : memref<1x2x40x128xf32, #tpu.memory_space<vmem>>, vector<1x1x40x128xf32>
    %210 = vector.shape_cast %209 : vector<1x1x40x128xf32> to vector<40x128xf32>
    %211 = vector.shape_cast %208 : vector<40x128xf32> to vector<1x1x40x128xf32>
    tpu.vector_store %arg4[%c0_50, %c1, %c0_51, %c0_52], %211 {strides = array<i32>} : memref<1x2x40x128xf32, #tpu.memory_space<vmem>>, vector<1x1x40x128xf32>,
    return
  }
  func.func @transform_0(%arg0: i32, %arg1: i32) -> (i32, i32, i32) {
    %c0_i32 = arith.constant 0 : i32
    %c0_i32_0 = arith.constant 0 : i32
    %c0_i32_1 = arith.constant 0 : i32
    return %arg0, %c0_i32, %c0_i32_0 : i32, i32, i32
  }
  func.func @transform_1(%arg0: i32, %arg1: i32) -> (i32, i32) {
    %c0_i32 = arith.constant 0 : i32
    %c0_i32_0 = arith.constant 0 : i32
    return %c0_i32, %arg1 : i32, i32
  }
  func.func @transform_2(%arg0: i32, %arg1: i32) -> (i32, i32, i32, i32) {
    %c0_i32 = arith.constant 0 : i32
    %c0_i32_0 = arith.constant 0 : i32
    %c0_i32_1 = arith.constant 0 : i32
    return %arg0, %c0_i32, %c0_i32_0, %arg1 : i32, i32, i32, i32
  }
}

</mosaic_0001>

<bundles_post_ra>
// kernel: tpu_custom_call.1
= control target key start
LH: loop header
LB: loop body
LE: loop exit
PB: predicated region body
PF: predicated region fallthrough
CT: control target
= control target key end

     0   :  { %7 = vsyncpa [#allocation3], 0  ;;  %s1946_s0 = inlined_call_operand.hbm [shape: bf16[2,128,128], index: 0, kind: input, shape index: {}]   ;;  %s1947_s1 = inlined_call_operand.hbm [shape: bf16[128,128], index: 1, kind: input, shape index: {}]   ;;  %s1948_s2 = inlined_call_operand.hbm [shape: f32[2,2,40,128], index: 2, kind: output, shape index: {}]  }
   0x1   :  { %9 = vsyncpa [#allocation3 + $0x1], 0 }
   0x2   :  { %10 = vsyncpa [#allocation6], 0 }
   0x3   :  { %11 = vsyncpa [#allocation4], 0 }
   0x4   :  { %13 = vsyncpa [#allocation4 + $0x1], 0  ;;  %s1465_s9 = smov 0   ;;  %s1467_s10 = smov 0  }
   0x5   :  { %s1469_s11 = smov 0   ;;  %s1471_s12 = smov 0  }
   0x6   :  { %s1473_s13 = smov 0   ;;  %s1475_s14 = smov 0  }
   0x7 LB: > { %s1076_s15 = sadd.s32 4294967295, %s1441_s14   ;;  %s1077_s16 = sadd.s32 4294967294, %s1441_s14   ;;  %s1441_s14 = sphi %s1475_s14, %s19_s14   ;;  %s1437_s13 = sphi %s1473_s13, %s1979_s13   ;;  %s1433_s12 = sphi %s1471_s12, %s1978_s12   ;;  %s1429_s11 = sphi %s1469_s11, %s1977_s11   ;;  %s1425_s10 = sphi %s1467_s10, %s1976_s10   ;;  %s1421_s9 = sphi %s1465_s9, %s1975_s9  }
   0x8   : > { %p51_p0 = scmp.ne.s32.totalorder %s1425_s10, %s1421_s9  ;;  %p1499_p1 = scmp.eq.s32.totalorder %s1076_s15, 0 }
   0x9   : > { %p1503_p2 = scmp.eq.s32.totalorder %s1076_s15, 1  ;;  %p109_p3 = scmp.eq.s32.totalorder %s1077_s16, 1 }
   0xa   : > { %p1509_p4 = por %p1499_p1, %p51_p0  ;;  %p1078_p5 = scmp.ge.s32.totalorder %s1441_s14, 1 }
   0xb   : > { %p1514_p6 = por %p109_p3, %p51_p0  ;;  %p116_p7 = scmp.lt.s32.totalorder %s1441_s14, 3 }
   0xc   : > { %s1956_s19 = scalar_select %p1509_p4, 1, 0 }
   0xd   : > { %s1957_s20 = scalar_select %p1514_p6, 1, 0 }
   0xe   : > { %p1519_p8 = pnand %p1078_p5, %p116_p7  ;;  %s1443_s22 = smov [#allocation5]  }
   0xf   : > { %s130_s23 = sshll.u32 %s1443_s22, 4  ;;  %s31_s25 = sadd.s32 1, %s1437_s13  ;;  %s131_s23 = int_to_ptr.vmem [resolvable:$true] %s130_s23 }
  0x10   : > { %p1218_p9 = pneg %p1519_p8  ;;  %s1314_s26 = scalar_lea.vmem %s131_s23, 1024 }
  0x11   : > { %p1315_p13 = scmp.ne.s32.totalorder %s131_s23, %s1314_s26  ;;  %p1322_p5 = scmp.lt.s32.totalorder %s131_s23, %s131_s23 }
  0x12   : > { %p1528_p11 = pnand %p1218_p9, %p1499_p1  ;;  %p1323_p7 = scmp.lt.s32.totalorder %s1314_s26, %s1314_s26 }
  0x14   : > { %p1305_p12 = pneg %p1528_p11  ;;  %p1324_p6 = por %p1323_p7, %p1322_p5 }
  0x16   : > { %p1317_p0 = pnand %p1315_p13, %p1305_p12 }
  0x18   : > { %p1318_p3 = pneg %p1317_p0 }
  0x1a   : > { %p1325_p4 = pnand %p1324_p6, %p1318_p3 }
  0x1c   : > { %1328 = shalt.err (!%p1325_p4)
}
  0x1d   : > { %s1950_s27 = smov 64   ;;  %s1445_s28 = smov 4  }
  0x1e   : > { %1221 = dma.hbm_to_vmem [thread:$0]  (!%p1528_p11), %s1947_s1, 1024, %s131_s23, [#allocation6], %s1950_s27, %s1950_s27, %s1445_s28  }
  0x1f   : > { %p33_p4 = scmp.ge.s32.totalorder %s31_s25, 2  ;;  %s38_s3 = sadd.s32 1, %s1429_s11 }
  0x20   : > { %p45_p6 = scmp.ne.s32.totalorder %s1429_s11, %s1425_s10  ;;  %p46_p9 = scmp.eq.s32.totalorder %s1441_s14, 0 }
  0x21   : > { %s1981_s25 = smov (%p33_p4, %s31_s25), 0  ;;  %p1231_p0 = scmp.lt.s32.totalorder %s1441_s14, 2 }
  0x22   : > { %p1549_p12 = por %p46_p9, %p45_p6  ;;  %p1555_p13 = por %p1503_p2, %p45_p6 }
  0x23   : > { %s35_s6 = ssub.s32 %s1437_s13, %s1981_s25  ;;  %s144_s7 = sand.u32 1, %s1429_s11  }
  0x24   : > { %p36_p11 = scmp.eq.s32.totalorder %s35_s6, 0  ;;  %s1081_s8 = sshll.u32 %s144_s7, 6 }
  0x25   : > { %s1143_s16 = sshll.u32 %s1437_s13, 10  ;;  %s148_s26 = scalar_lea.vmem [#allocation2], %s1081_s8 }
  0x26   : > { %s1564_s15 = scalar_select %p36_p11, %s1429_s11, %s38_s3  }
  0x27   : > { %s154_s24 = scalar_lea.hbm %s1946_s0, %s1143_s16  ;;  %s155_s29 = sshll.u32 %s148_s26, 4  ;;  %s156_s29 = int_to_ptr.vmem [resolvable:$true] %s155_s29 }
  0x28   : > { %p1572_p2 = pnand %p1231_p0, %p1549_p12  ;;  %s145_s30 = scalar_lea.sflag [#allocation3], %s144_s7 }
  0x29   : > { %s1342_s6 = scalar_lea.vmem %s156_s29, 1024  ;;  %s1446_s3 = smov [#allocation2]  }
  0x2a   : > { %p1331_p3 = pneg %p1572_p2  ;;  %p1343_p5 = scmp.ne.s32.totalorder %s156_s29, %s1342_s6 }
  0x2b   : > { %s1347_s27 = sshll.u32 %s1446_s3, 4  ;;  %s1348_s27 = int_to_ptr.vmem [resolvable:$false] %s1347_s27 }
  0x2c   : > { %p1345_p7 = pnand %p1343_p5, %p1331_p3  ;;  %s1349_s16 = scalar_lea.vmem %s1348_s27, 2048 }
  0x2d   : > { %p1350_p6 = scmp.lt.s32.totalorder %s156_s29, %s1348_s27  ;;  %p1351_p9 = scmp.lt.s32.totalorder %s1349_s16, %s1342_s6 }
  0x2e   : > { %p1346_p4 = pneg %p1345_p7 }
  0x2f   : > { %p1352_p11 = por %p1351_p9, %p1350_p6 }
  0x31   : > { %p1353_p10 = pnand %p1352_p11, %p1346_p4 }
  0x33   : > { %1356 = shalt.err (!%p1353_p10)
}
  0x34   : > { %s1963_s4 = smov 64   ;;  %167 = sbr.rel (%p1519_p8) target bundleno = 392 (0x188), region = 28 }
  0x35   : > { %1225 = dma.hbm_to_vmem [thread:$0]  (!%p1572_p2), %s154_s24, 1024, %s156_s29, %s145_s30, %s1963_s4, %s1963_s4, %s1445_s28  }
  0x36   : > { %s1586_s7 = sand.u32 (!%p1519_p8), 1, %s1425_s10   ;;  %p1964_p10 = scmp.ne.s32.totalorder (!%p1519_p8), %s1956_s19, 0 }
  0x37   : > { %s1085_s27 = sshll.u32 (!%p1519_p8), %s1586_s7, 6  ;;  %s170_s8 = scalar_lea.sflag (!%p1519_p8), [#allocation3], %s1586_s7 }
  0x38   : > { %s1590_s22 = scalar_lea.vmem (!%p1519_p8), [#allocation2], %s1085_s27 }
  0x39   : > { %1408 = dma.done.wait (%p1964_p10), %s170_s8, 1024  }
  0x3a   : > { %1410 = vsyncadd (%p1964_p10), %s170_s8, 4294966272 }
  0x3b   : > { %1412 = dma.done.wait (%p1499_p1), [#allocation6], 1024  }
  0x3c   : > { %1414 = vsyncadd (%p1499_p1), [#allocation6], 4294966272  ;;  %v1287_v0 = vld [vmem:[#allocation5 + $0x38] sm:$0xff]   ;;  %v1288_v1 = vld [vmem:[#allocation5 + $0x30] sm:$0xff]   ;;  %vm508_vm0 = vcmask 1044480   ;;  %vm799_vm1 = vcmask 1040384  }
  0x3d   : > { %1160 = vmatprep.subr.bf16.mxu0 %v1287_v0  ;;  %1192 = vmatprep.subr.bf16.mxu1 %v1287_v0  ;;  %v1289_v2 = vld [vmem:[#allocation5 + $0x28] sm:$0xff]   ;;  %v1290_v3 = vld [vmem:[#allocation5 + $0x20] sm:$0xff]   ;;  %v1291_v6 = vld [vmem:[#allocation5 + $0x18] sm:$0xff]   ;;  %vm802_vm2 = vcmask 1041408   ;;  %vm805_vm3 = vcmask 1042432   ;;  %vm808_vm4 = vcmask 1043456  }
  0x3e   : > { %1161 = vmatpush3.bf16.msra.mxu0 %v1287_v0  ;;  %1200 = vmatpush3.bf16.msra.mxu1 %v1287_v0  ;;  %v1295_v4 = vld [vmem:[%s1590_s22] sm:$0xff]   ;;  %v1292_v7 = vld [vmem:[#allocation5 + $0x10] sm:$0xff]   ;;  %v1293_v8 = vld [vmem:[#allocation5 + $0x8] sm:$0xff]   ;;  %vm813_vm5 = vcmask 1045504   ;;  %s1208_s17 = smul.u32 80, %s1586_s7  ;;  %vm816_vm6 = vcmask 1046528  }
  0x3f   : > { %1162 = vmatprep.subr.bf16.mxu0 %v1288_v1  ;;  %1193 = vmatprep.subr.bf16.mxu1 %v1288_v1  ;;  %v1296_v5 = vld [vmem:[%s1590_s22 + $0x20] sm:$0xff]   ;;  %v1297_v10 = vld [vmem:[%s1590_s22 + $0x8] sm:$0xff]   ;;  %v1299_v12 = vld [vmem:[%s1590_s22 + $0x10] sm:$0xff]   ;;  %s1209_s21 = smul.u32 1280, %s1433_s12  ;;  %s967_s26 = scalar_lea.sflag [#allocation4], %s1586_s7 }
  0x40   : > { %1176 = vmatprep.mubr.bf16.mxu0 %v1295_v4  ;;  %1184 = vmatprep.mubr.bf16.mxu1 %v1296_v5  ;;  %v1294_v9 = vld [vmem:[#allocation5] sm:$0xff]   ;;  %v1298_v11 = vld [vmem:[%s1590_s22 + $0x28] sm:$0xff]   ;;  %v1300_v13 = vld [vmem:[%s1590_s22 + $0x30] sm:$0xff]   ;;  %s1768_s19 = scalar_lea.vmem [#allocation7], %s1208_s17  ;;  %s1447_s18 = smov [#allocation7]  }
  0x41   : > { %v1301_v14 = vld [vmem:[%s1590_s22 + $0x18] sm:$0xff]   ;;  %s981_s28 = sshll.u32 %s1768_s19, 4  ;;  %s1892_s24 = scalar_lea.hbm %s1948_s2, %s1209_s21  ;;  %s1896_s28 = int_to_ptr.vmem [resolvable:$true] %s981_s28 }
  0x42   : > { %1163 = vmatpush3.bf16.msra.mxu0 %v1288_v1  ;;  %1201 = vmatpush3.bf16.msra.mxu1 %v1288_v1  ;;  %v1302_v15 = vld [vmem:[%s1590_s22 + $0x38] sm:$0xff]   ;;  %s1357_s29 = scalar_lea.vmem %s1896_s28, 1280  ;;  %s1361_s30 = sshll.u32 %s1447_s18, 4  ;;  %s1362_s30 = int_to_ptr.vmem [resolvable:$false] %s1361_s30 }
  0x43   : > { %1164 = vmatprep.subr.bf16.mxu0 %v1289_v2  ;;  %1194 = vmatprep.subr.bf16.mxu1 %v1289_v2  ;;  %p1358_p1 = scmp.ne.s32.totalorder %s1896_s28, %s1357_s29  ;;  %s1363_s6 = scalar_lea.vmem %s1362_s30, 2560 }
  0x44   : > { %p1364_p0 = scmp.lt.s32.totalorder %s1896_s28, %s1362_s30  ;;  %p1365_p2 = scmp.lt.s32.totalorder %s1363_s6, %s1357_s29 }
  0x45   : > { %p1359_p8 = pnand %p1358_p1, %p1555_p13 }
  0x46   : > { %1165 = vmatpush3.bf16.msra.mxu0 %v1289_v2  ;;  %1202 = vmatpush3.bf16.msra.mxu1 %v1289_v2  ;;  %p1366_p3 = por %p1365_p2, %p1364_p0 }
  0x47   : > { %1166 = vmatprep.subr.bf16.mxu0 %v1290_v3  ;;  %1195 = vmatprep.subr.bf16.mxu1 %v1290_v3  ;;  %p1360_p12 = pneg %p1359_p8 }
  0x49   : > { %p1367_p5 = pnand %p1366_p3, %p1360_p12 }
  0x4a   : > { %1167 = vmatpush3.bf16.msra.mxu0 %v1290_v3  ;;  %1203 = vmatpush3.bf16.msra.mxu1 %v1290_v3 }
  0x4b   : > { %1168 = vmatprep.subr.bf16.mxu0 %v1291_v6  ;;  %1196 = vmatprep.subr.bf16.mxu1 %v1291_v6 }
  0x4e   : > { %1169 = vmatpush3.bf16.msra.mxu0 %v1291_v6  ;;  %1204 = vmatpush3.bf16.msra.mxu1 %v1291_v6 }
  0x4f   : > { %1170 = vmatprep.subr.bf16.mxu0 %v1292_v7  ;;  %1197 = vmatprep.subr.bf16.mxu1 %v1292_v7 }
  0x52   : > { %1171 = vmatpush3.bf16.msra.mxu0 %v1292_v7  ;;  %1205 = vmatpush3.bf16.msra.mxu1 %v1292_v7 }
  0x53   : > { %1172 = vmatprep.subr.bf16.mxu0 %v1293_v8  ;;  %1198 = vmatprep.subr.bf16.mxu1 %v1293_v8 }
  0x56   : > { %1173 = vmatpush3.bf16.msra.mxu0 %v1293_v8  ;;  %1206 = vmatpush3.bf16.msra.mxu1 %v1293_v8 }
  0x57   : > { %1174 = vmatprep.subr.bf16.mxu0 %v1294_v9  ;;  %1199 = vmatprep.subr.bf16.mxu1 %v1294_v9 }
  0x5a   : > { %1175 = vmatpush3.bf16.msra.mxu0 %v1294_v9  ;;  %1207 = vmatpush3.bf16.msra.mxu1 %v1294_v9 }
  0x5d   : > { %1177 = vmatmul.mubr.bf16.vlgmr.msra.gmra.mxu0 %v1297_v10  ;;  %1185 = vmatmul.mubr.bf16.vlgmr.msra.gmra.mxu1 %v1298_v11 }
  0x5e   : > { %1180 = vmatprep.mubr.bf16.mxu0 %v1299_v12  ;;  %1188 = vmatprep.mubr.bf16.mxu1 %v1300_v13 }
  0x65   : > { %1181 = vmatmul.mubr.bf16.gmra.mxu0 %v1301_v14  ;;  %1189 = vmatmul.mubr.bf16.gmra.mxu1 %v1302_v15 }
 0x11d   : > { %v1178_v16 = vpop.f32.mrf.mxu0  ;;  %v1186_v17 = vpop.f32.mrf.mxu1 }
 0x11e   : > { %v1608_v18 = vadd.f32 -1.0, %v1178_v16  ;;  %v458_v19 = vsub.f32 0.0, %v1178_v16  ;;  %v1113_v20 = vadd.f32 -1.0, %v1186_v17  ;;  %v466_v21 = vsub.f32 0.0, %v1186_v17 }
 0x11f   : > { %v361_v22 = vpop.f32.mrf.mxu0  ;;  %v393_v23 = vpop.f32.mrf.mxu1 }
 0x120   : > { %v442_v24 = vmax.f32 %v1608_v18, 0.0  ;;  %v1611_v25 = vadd.f32 -1.0, %v458_v19  ;;  %v450_v26 = vmax.f32 %v1113_v20, 0.0  ;;  %v1129_v27 = vadd.f32 -1.0, %v466_v21 }
 0x121   : > { %v1103_v28 = vadd.f32 -1.0, %v361_v22  ;;  %v456_v29 = vsub.f32 0.0, %v361_v22  ;;  %v1111_v30 = vadd.f32 -1.0, %v393_v23  ;;  %v464_v31 = vsub.f32 0.0, %v393_v23  ;;  %v1179_v32 = vpop.f32.mrf.mxu0  ;;  %v1187_v33 = vpop.f32.mrf.mxu1 }
 0x122   : > { %v490_v34 = vmax.f32 %v1611_v25, 0.0  ;;  %v498_v35 = vmax.f32 %v1129_v27, 0.0  ;;  %v510_v39 = vrot.slane %v442_v24, 3  ;;  %v1618_v41 = vadd.f32 -1.0, %v1179_v32 }
 0x123   : > { %v1119_v36 = vadd.f32 -1.0, %v456_v29  ;;  %v1614_v37 = vadd.f32 -1.0, %v464_v31  ;;  %v364_v38 = vpop.f32.mrf.mxu0  ;;  %v448_v40 = vmax.f32 %v1111_v30, 0.0  ;;  %v459_v42 = vsub.f32 0.0, %v1179_v32  ;;  %v396_v43 = vpop.f32.mrf.mxu1 }
 0x124   : > { %v640_v44 = vrot.slane %v450_v26, 3  ;;  %v440_v45 = vmax.f32 %v1103_v28, 0.0  ;;  %v1621_v47 = vadd.f32 -1.0, %v1187_v33  ;;  %v513_v48 = vrot.slane %v490_v34, 3 }
 0x125   : > { %v496_v46 = vmax.f32 %v1614_v37, 0.0  ;;  %v643_v49 = vrot.slane %v498_v35, 3  ;;  %v1625_v50 = vadd.f32 -1.0, %v459_v42  ;;  %v1104_v51 = vadd.f32 -1.0, %v364_v38  ;;  %v1630_v60 = vpop.f32.mrf.mxu0 }
 0x126   : > { %v488_v52 = vmax.f32 %v1119_v36, 0.0  ;;  %v467_v53 = vsub.f32 0.0, %v1187_v33  ;;  %v457_v54 = vsub.f32 0.0, %v364_v38  ;;  %v1112_v55 = vadd.f32 -1.0, %v396_v43 }
 0x127   : > { %v1627_v56 = vrot.slane %v448_v40, 3  ;;  %v443_v57 = vmax.f32 %v1618_v41, 0.0  ;;  %v441_v58 = vmax.f32 %v1104_v51, 0.0  ;;  %v465_v59 = vsub.f32 0.0, %v396_v43 }
 0x128   : > { %v1632_v61 = vrot.slane %v496_v46, 3  ;;  %v1120_v63 = vadd.f32 -1.0, %v457_v54  ;;  %v449_v0 = vmax.f32 %v1112_v55, 0.0  ;;  %v1636_v5 = vadd.f32 -1.0, %v467_v53 }
 0x129   : > { %v509_v2 = vrot.slane %v441_v58, 3  ;;  %v521_v3 = vadd.f32 %v510_v39, %v441_v58  ;;  %v1128_v4 = vadd.f32 -1.0, %v465_v59  ;;  %v1639_v8 = vadd.f32 -1.0, %v1630_v60 }
 0x12a   : > { %v489_v6 = vmax.f32 %v1120_v63, 0.0  ;;  %v639_v7 = vrot.slane %v449_v0, 3  ;;  %v462_v12 = vsub.f32 0.0, %v1630_v60  ;;  %v651_v21 = vadd.f32 %v640_v44, %v449_v0 }
 0x12b   : > { %v511_v9 = vsel %vm508_vm0, %v509_v2, %v510_v39  ;;  %v535_v10 = vrot.slane %v521_v3, 1  ;;  %v497_v11 = vmax.f32 %v1128_v4, 0.0  ;;  %v543_v29 = vmul.f32 0.5, %v521_v3 }
 0x12c   : > { %v512_v13 = vrot.slane %v489_v6, 3  ;;  %v519_v14 = vadd.f32 %v511_v9, %v440_v45  ;;  %v522_v15 = vadd.f32 %v513_v48, %v489_v6  ;;  %v641_v16 = vsel %vm508_vm0, %v639_v7, %v640_v44 }
 0x12d   : > { %v539_v17 = vadd.f32 %v535_v10, %v521_v3  ;;  %v642_v19 = vrot.slane %v497_v11, 3  ;;  %v649_v20 = vadd.f32 %v641_v16, %v448_v40  ;;  %v652_v31 = vadd.f32 %v643_v49, %v497_v11 }
 0x12e   : > { %v514_v23 = vsel %vm508_vm0, %v512_v13, %v513_v48  ;;  %v525_v26 = vrot.slane %v519_v14, 1  ;;  %v536_v27 = vrot.slane %v522_v15, 1  ;;  %v1647_v35 = vmul.f32 0.5, %v522_v15  ;;  %v1190_v13 = vpop.f32.mrf.mxu1 }
 0x12f   : > { %v520_v28 = vadd.f32 %v514_v23, %v488_v52  ;;  %v644_v30 = vsel %vm508_vm0, %v642_v19, %v643_v49  ;;  %v541_v38 = vmul.f32 0.25, %v539_v17  ;;  %v655_v39 = vrot.slane %v649_v20, 1  ;;  %v377_v19 = vpop.f32.mrf.mxu0 }
 0x130   : > { %v529_v32 = vadd.f32 %v525_v26, %v519_v14  ;;  %v540_v33 = vadd.f32 %v536_v27, %v522_v15  ;;  %v650_v36 = vadd.f32 %v644_v30, %v496_v46  ;;  %v665_v40 = vrot.slane %v651_v21, 1 }
 0x131   : > { %v526_v37 = vrot.slane %v520_v28, 1  ;;  %v666_v44 = vrot.slane %v652_v31, 1  ;;  %v446_v45 = vmax.f32 %v1639_v8, 0.0  ;;  %v755_v51 = vrot.slane %v543_v29, 5 }
 0x132   : > { %v531_v42 = vmul.f32 0.25, %v529_v32  ;;  %v656_v43 = vrot.slane %v650_v36, 1  ;;  %v659_v52 = vadd.f32 %v655_v39, %v649_v20  ;;  %v669_v53 = vadd.f32 %v665_v40, %v651_v21 }
 0x133   : > { %v530_v48 = vadd.f32 %v526_v37, %v520_v28  ;;  %v542_v49 = vmul.f32 0.25, %v540_v33  ;;  %v756_v58 = vrot.slane %v1647_v35, 5  ;;  %v749_v46 = vrot.slane %v541_v38, 4  ;;  %v409_v38 = vpop.f32.mrf.mxu1 }
 0x134   : > { %v735_v54 = vrot.slane %v531_v42, 1  ;;  %v739_v55 = vrot.slane %v531_v42, 2  ;;  %v660_v63 = vadd.f32 %v656_v43, %v650_v36  ;;  %v670_v0 = vadd.f32 %v666_v44, %v652_v31  ;;  %v1183_v43 = vpop.f32.mrf.mxu0 }
 0x135   : > { %v532_v59 = vmul.f32 0.25, %v530_v48  ;;  %v743_v2 = vrot.slane %v531_v42, 3  ;;  %v1652_v4 = vmul.f32 0.25, %v659_v52  ;;  %v1654_v6 = vmul.f32 0.5, %v651_v21 }
 0x136   : > { %v800_v3 = vsel %vm799_vm1, %v531_v42, %v735_v54  ;;  %v1657_v11 = vmul.f32 0.25, %v669_v53  ;;  %v750_v14 = vrot.slane %v542_v49, 4  ;;  %v1660_v16 = vmul.f32 0.25, %v660_v63 }
 0x137   : > { %v736_v7 = vrot.slane %v532_v59, 1  ;;  %v740_v9 = vrot.slane %v532_v59, 2  ;;  %v803_v10 = vsel %vm802_vm2, %v800_v3, %v739_v55  ;;  %v1662_v17 = vmul.f32 0.25, %v670_v0 }
 0x138   : > { %v806_v15 = vsel %vm805_vm3, %v803_v10, %v743_v2  ;;  %v744_v20 = vrot.slane %v532_v59, 3  ;;  %v1666_v26 = vmul.f32 0.5, %v652_v31  ;;  %v845_v28 = vrot.slane %v1652_v4, 1 }
 0x139   : > { %v801_v23 = vsel %vm799_vm1, %v532_v59, %v736_v7  ;;  %v809_v21 = vsel %vm808_vm4, %v806_v15, %v749_v46  ;;  %v849_v29 = vrot.slane %v1652_v4, 2  ;;  %v846_v36 = vrot.slane %v1660_v16, 1 }
 0x13a   : > { %v804_v27 = vsel %vm802_vm2, %v801_v23, %v740_v9  ;;  %v1674_v33 = vsel %vm508_vm0, %v809_v21, %v755_v51  ;;  %v855_v37 = vrot.slane %v1657_v11, 3  ;;  %v850_v31 = vrot.slane %v1660_v16, 2 }
 0x13b   : > { %v807_v32 = vsel %vm805_vm3, %v804_v27, %v744_v20  ;;  %v856_v39 = vrot.slane %v1662_v17, 3  ;;  %v859_v40 = vrot.slane %v1657_v11, 4  ;;  %v860_v42 = vrot.slane %v1662_v17, 4 }
 0x13c   : > { %v810_v44 = vsel %vm808_vm4, %v807_v32, %v750_v14  ;;  %v1117_v48 = vadd.f32 -1.0, %v1190_v13  ;;  %v470_v52 = vsub.f32 0.0, %v1190_v13  ;;  %v1683_v51 = vadd.f32 -1.0, %v377_v19  ;;  %v1191_v14 = vpop.f32.mrf.mxu1 }
 0x13d   : > { %v1125_v53 = vadd.f32 -1.0, %v462_v12  ;;  %v460_v49 = vsub.f32 0.0, %v377_v19  ;;  %v1687_v54 = vadd.f32 -1.0, %v409_v38  ;;  %v468_v55 = vsub.f32 0.0, %v409_v38 }
 0x13e   : > { %v454_v59 = vmax.f32 %v1117_v48, 0.0  ;;  %v1133_v46 = vadd.f32 -1.0, %v470_v52  ;;  %v444_v63 = vmax.f32 %v1683_v51, 0.0  ;;  %v1110_v0 = vadd.f32 -1.0, %v1183_v43 }
 0x13f   : > { %v1693_v3 = vrot.slane %v446_v45, 3  ;;  %v1695_v7 = vadd.f32 -1.0, %v460_v49  ;;  %v1697_v9 = vadd.f32 -1.0, %v468_v55  ;;  %v494_v15 = vmax.f32 %v1125_v53, 0.0 }
 0x140   : > { %v502_v60 = vmax.f32 %v1133_v46, 0.0  ;;  %v725_v12 = vrot.slane %v454_v59, 1  ;;  %v1701_v10 = vrot.slane %v444_v63, 3  ;;  %v447_v13 = vmax.f32 %v1110_v0, 0.0 }
 0x141   : > { %v1953_v19 = vmax.f32 %v1695_v7, 0.0  ;;  %v1951_v20 = vmax.f32 %v1687_v54, 0.0  ;;  %v463_v23 = vsub.f32 0.0, %v1183_v43  ;;  %v1952_v52 = vmax.f32 %v1697_v9, 0.0 }
 0x142   : > { %v726_v21 = vrot.slane %v502_v60, 1  ;;  %v729_v27 = vadd.f32 %v725_v12, %v454_v59  ;;  %v561_v32 = vadd.f32 %v1701_v10, %v442_v24  ;;  %v1708_v38 = vrot.slane %v447_v13, 3 }
 0x143   : > { %v1712_v48 = vrot.slane %v1953_v19, 3  ;;  %v1126_v53 = vadd.f32 -1.0, %v463_v23  ;;  %v1118_v49 = vadd.f32 -1.0, %v1191_v14  ;;  %v812_v24 = vsel %vm508_vm0, %v810_v44, %v756_v58 }
 0x144   : > { %v730_v55 = vadd.f32 %v726_v21, %v502_v60  ;;  %v1715_v46 = vmul.f32 0.5, %v729_v27  ;;  %v569_v43 = vrot.slane %v561_v32, 1  ;;  %v602_v18 = vsel %vm508_vm0, %v1708_v38, %v1627_v56 }
 0x145   : > { %v562_v59 = vadd.f32 %v1712_v48, %v490_v34  ;;  %v495_v0 = vmax.f32 %v1126_v53, 0.0  ;;  %v611_v12 = vadd.f32 %v602_v18, %v446_v45  ;;  %v598_v60 = vrot.slane %v494_v15, 3 }
 0x146   : > { %v1728_v13 = vmul.f32 0.5, %v730_v55  ;;  %v929_v23 = vrot.slane %v1715_v46, 2  ;;  %v455_v21 = vmax.f32 %v1118_v49, 0.0  ;;  %v933_v56 = vrot.slane %v1715_v46, 3 }
 0x147   : > { %v570_v35 = vrot.slane %v562_v59, 1  ;;  %v573_v27 = vadd.f32 %v569_v43, %v561_v32  ;;  %v599_v58 = vrot.slane %v495_v0, 3  ;;  %v937_v34 = vrot.slane %v1715_v46, 4 }
 0x148   : > { %v930_v25 = vrot.slane %v1728_v13, 2  ;;  %v1736_v8 = vrot.slane %v1951_v20, 3  ;;  %v1740_v45 = vrot.slane %v1952_v52, 3  ;;  %v934_v44 = vrot.slane %v1728_v13, 3 }
 0x149   : > { %v574_v53 = vadd.f32 %v570_v35, %v562_v59  ;;  %v604_v49 = vsel %vm508_vm0, %v599_v58, %v1632_v61  ;;  %v625_v32 = vrot.slane %v611_v12, 1  ;;  %v938_v55 = vrot.slane %v1728_v13, 4 }
 0x14a   : > { %v612_v43 = vadd.f32 %v604_v49, %v494_v15  ;;  %v633_v18 = vmul.f32 0.5, %v611_v12  ;;  %v471_v0 = vsub.f32 0.0, %v1191_v14  ;;  %v575_v22 = vmul.f32 0.25, %v573_v27  ;;  %v380_v14 = vpop.f32.mrf.mxu0 }
 0x14b   : > { %v629_v62 = vadd.f32 %v625_v32, %v611_v12  ;;  %v943_v20 = vrot.slane %v455_v21, 5  ;;  %v947_v2 = vsel %vm799_vm1, %v929_v23, %v933_v56  ;;  %v576_v52 = vmul.f32 0.25, %v574_v53 }
 0x14c   : > { %v626_v30 = vrot.slane %v612_v43, 1  ;;  %v634_v1 = vmul.f32 0.5, %v612_v43  ;;  %v1134_v19 = vadd.f32 -1.0, %v471_v0  ;;  %v1750_v59 = vsel %vm813_vm5, %v1674_v33, %v575_v22 }
 0x14d   : > { %v1752_v61 = vmul.f32 0.25, %v629_v62  ;;  %v948_v15 = vsel %vm799_vm1, %v930_v25, %v934_v44  ;;  %v949_v35 = vsel %vm802_vm2, %v947_v2, %v937_v34  ;;  %v1757_v12 = vsel %vm813_vm5, %v812_v24, %v576_v52 }
 0x14e   : > { %v630_v21 = vadd.f32 %v626_v30, %v612_v43  ;;  %v839_v23 = vrot.slane %v633_v18, 5  ;;  %v503_v56 = vmax.f32 %v1134_v19, 0.0  ;;  %v840_v53 = vrot.slane %v634_v1, 5  ;;  %v412_v19 = vpop.f32.mrf.mxu1 }
 0x14f   : > { %v833_v27 = vrot.slane %v1752_v61, 4  ;;  %v950_v49 = vsel %vm802_vm2, %v948_v15, %v938_v55  ;;  %v951_v22 = vsel %vm805_vm3, %v949_v35, %v943_v20  ;;  %v791_v33 = vrot.slane %v1752_v61, 2 }
 0x150   : > { %v1762_v62 = vmul.f32 0.25, %v630_v21  ;;  %v953_v2 = vsel %vm808_vm4, %v951_v22, 0.0  ;;  %v1108_v25 = vadd.f32 -1.0, %v380_v14  ;;  %v795_v52 = vrot.slane %v1752_v61, 3 }
 0x151   : > { %v901_v30 = vsel %vm799_vm1, %v833_v27, %v839_v23  ;;  %v944_v24 = vrot.slane %v503_v56, 5  ;;  %959 = vst [vmem:[%s1768_s19 + $0x20] sm:$0xff] %v953_v2  ;;  %v461_v1 = vsub.f32 0.0, %v380_v14  ;;  %v597_v44 = vsel %vm508_vm0, %v1693_v3, %v1708_v38 }
 0x152   : > { %v834_v20 = vrot.slane %v1762_v62, 4  ;;  %v903_v34 = vsel %vm802_vm2, %v901_v30, %v1652_v4  ;;  %v600_v32 = vsel %vm508_vm0, %v598_v60, %v599_v58  ;;  %v445_v18 = vmax.f32 %v1108_v25, 0.0 }
 0x153   : > { %v905_v55 = vsel %vm805_vm3, %v903_v34, %v845_v28  ;;  %v952_v43 = vsel %vm805_vm3, %v950_v49, %v944_v24  ;;  %v1124_v0 = vadd.f32 -1.0, %v461_v1  ;;  %v1116_v3 = vadd.f32 -1.0, %v412_v19 }
 0x154   : > { %v902_v15 = vsel %vm799_vm1, %v834_v20, %v840_v53  ;;  %v907_v35 = vsel %vm808_vm4, %v905_v55, %v849_v29  ;;  %v954_v14 = vsel %vm808_vm4, %v952_v43, 0.0  ;;  %v551_v58 = vrot.slane %v445_v18, 3 }
 0x155   : > { %v904_v38 = vsel %vm802_vm2, %v902_v15, %v1660_v16  ;;  %v909_v28 = vsel %vm508_vm0, %v907_v35, %v855_v37  ;;  %1139 = vst [vmem:[%s1768_s19 + $0x48] sm:$0xff] %v954_v14  ;;  %v493_v60 = vmax.f32 %v1124_v0, 0.0  ;;  %v609_v29 = vadd.f32 %v597_v44, %v445_v18 }
 0x156   : > { %v906_v21 = vsel %vm805_vm3, %v904_v38, %v846_v36  ;;  %v911_v4 = vsel %vm813_vm5, %v909_v28, %v859_v40  ;;  %v1799_v23 = vmax.f32 %v1116_v3, 0.0  ;;  %v552_v37 = vsel %vm508_vm0, %v1701_v10, %v551_v58 }
 0x157   : > { %v908_v56 = vsel %vm808_vm4, %v906_v21, %v850_v31  ;;  %v553_v27 = vrot.slane %v493_v60, 3  ;;  %v565_v53 = vadd.f32 %v551_v58, %v444_v63  ;;  %v563_v36 = vadd.f32 %v552_v37, %v443_v57 }
 0x158   : > { %v910_v11 = vsel %vm508_vm0, %v908_v56, %v856_v39  ;;  %v610_v40 = vadd.f32 %v600_v32, %v493_v60  ;;  %v615_v49 = vrot.slane %v609_v29, 1  ;;  %v1965_v51 = vmax.f32 %v1695_v7, 0.0 }
 0x159   : > { %v912_v16 = vsel %vm813_vm5, %v910_v11, %v860_v42  ;;  %v554_v31 = vsel %vm508_vm0, %v1712_v48, %v553_v27  ;;  %v587_v10 = vmul.f32 0.5, %v565_v53  ;;  %v1966_v39 = vmax.f32 %v1625_v50, 0.0 }
 0x15a   : > { %v566_v63 = vadd.f32 %v553_v27, %v1965_v51  ;;  %v579_v41 = vrot.slane %v563_v36, 1  ;;  %v616_v57 = vrot.slane %v610_v40, 1  ;;  %v619_v2 = vadd.f32 %v615_v49, %v609_v29 }
 0x15b   : > { %v564_v22 = vadd.f32 %v554_v31, %v1966_v39  ;;  %v792_v25 = vrot.slane %v1762_v62, 2  ;;  %v1967_v42 = vrot.slane %v1654_v6, 5  ;;  %v1968_v48 = vrot.slane %v1666_v26, 5 }
 0x15c   : > { %v588_v17 = vmul.f32 0.5, %v566_v63  ;;  %v583_v1 = vadd.f32 %v579_v41, %v563_v36  ;;  %v620_v20 = vadd.f32 %v616_v57, %v610_v40  ;;  %v621_v34 = vmul.f32 0.25, %v619_v2 }
 0x15d   : > { %v913_v30 = vsel %vm816_vm6, %v911_v4, %v1967_v42  ;;  %v914_v7 = vsel %vm816_vm6, %v912_v16, %v1968_v48  ;;  %v580_v24 = vrot.slane %v564_v22, 1  ;;  %v796_v50 = vrot.slane %v1762_v62, 3 }
 0x15e   : > { %957 = vst [vmem:[%s1768_s19 + $0x10] sm:$0xff] %v913_v30  ;;  %1137 = vst [vmem:[%s1768_s19 + $0x38] sm:$0xff] %v914_v7  ;;  %v779_v44 = vrot.slane %v587_v10, 5  ;;  %v469_v32 = vsub.f32 0.0, %v412_v19  ;;  %v680_v55 = vrot.slane %v1799_v23, 3  ;;  %v585_v6 = vmul.f32 0.25, %v583_v1 }
 0x15f   : > { %v584_v43 = vadd.f32 %v580_v24, %v564_v22  ;;  %v622_v18 = vmul.f32 0.25, %v620_v20  ;;  %v780_v0 = vrot.slane %v588_v17, 5  ;;  %v785_v15 = vrot.slane %v621_v34, 1 }
 0x160   : > { %v1132_v26 = vadd.f32 -1.0, %v469_v32  ;;  %v681_v35 = vsel %vm508_vm0, %v1736_v8, %v680_v55  ;;  %v1969_v14 = vmax.f32 %v1687_v54, 0.0  ;;  %v761_v28 = vrot.slane %v585_v6, 1 }
 0x161   : > { %v586_v38 = vmul.f32 0.25, %v584_v43  ;;  %v765_v60 = vrot.slane %v585_v6, 2  ;;  %v769_v62 = vrot.slane %v585_v6, 3  ;;  %v773_v19 = vrot.slane %v585_v6, 4 }
 0x162   : > { %v691_v3 = vadd.f32 %v680_v55, %v1969_v14  ;;  %v786_v58 = vrot.slane %v622_v18, 1  ;;  %v501_v21 = vmax.f32 %v1132_v26, 0.0  ;;  %v1970_v4 = vmax.f32 %v1621_v47, 0.0 }
 0x163   : > { %v762_v56 = vrot.slane %v586_v38, 1  ;;  %v766_v37 = vrot.slane %v586_v38, 2  ;;  %v770_v27 = vrot.slane %v586_v38, 3  ;;  %v774_v53 = vrot.slane %v586_v38, 4 }
 0x164   : > { %v689_v29 = vadd.f32 %v681_v35, %v1970_v4  ;;  %v817_v54 = vsel %vm816_vm6, %v1750_v59, %v761_v28  ;;  %v819_v8 = vsel %vm799_vm1, %v765_v60, %v769_v62  ;;  %v683_v11 = vrot.slane %v501_v21, 3 }
 0x165   : > { %v818_v40 = vsel %vm816_vm6, %v1757_v12, %v762_v56  ;;  %v820_v49 = vsel %vm799_vm1, %v766_v37, %v770_v27  ;;  %v821_v47 = vsel %vm802_vm2, %v819_v8, %v773_v19  ;;  %955 = vst [vmem:[%s1768_s19] sm:$0xff] %v817_v54  ;;  %v705_v16 = vrot.slane %v691_v3, 1 }
 0x166   : > { %v695_v36 = vrot.slane %v689_v29, 1  ;;  %v822_v31 = vsel %vm802_vm2, %v820_v49, %v774_v53  ;;  %v823_v51 = vsel %vm805_vm3, %v821_v47, %v779_v44  ;;  %1135 = vst [vmem:[%s1768_s19 + $0x28] sm:$0xff] %v818_v40  ;;  %v684_v59 = vsel %vm508_vm0, %v1740_v45, %v683_v11 }
 0x167   : > { %v1971_v63 = vmax.f32 %v1697_v9, 0.0  ;;  %v824_v39 = vsel %vm805_vm3, %v822_v31, %v780_v0  ;;  %v825_v12 = vsel %vm808_vm4, %v823_v51, %v621_v34  ;;  %v1972_v22 = vmax.f32 %v1636_v5, 0.0 }
 0x168   : > { %v699_v57 = vadd.f32 %v695_v36, %v689_v29  ;;  %v826_v2 = vsel %vm808_vm4, %v824_v39, %v622_v18  ;;  %v827_v17 = vsel %vm508_vm0, %v825_v12, %v785_v15  ;;  %v709_v30 = vadd.f32 %v705_v16, %v691_v3 }
 0x169   : > { %v692_v10 = vadd.f32 %v683_v11, %v1971_v63  ;;  %v690_v41 = vadd.f32 %v684_v59, %v1972_v22  ;;  %v828_v45 = vsel %vm508_vm0, %v826_v2, %v786_v58  ;;  %v829_v9 = vsel %vm813_vm5, %v827_v17, %v791_v33 }
 0x16a   : > { %v701_v7 = vmul.f32 0.25, %v699_v57  ;;  %v830_v5 = vsel %vm813_vm5, %v828_v45, %v792_v25  ;;  %v831_v24 = vsel %vm816_vm6, %v829_v9, %v795_v52  ;;  %v715_v20 = vrot.slane %v1799_v23, 1 }
 0x16b   : > { %v706_v42 = vrot.slane %v692_v10, 1  ;;  %v696_v48 = vrot.slane %v690_v41, 1  ;;  %v832_v34 = vsel %vm816_vm6, %v830_v5, %v796_v50  ;;  %956 = vst [vmem:[%s1768_s19 + $0x8] sm:$0xff] %v831_v24  ;;  %v711_v32 = vmul.f32 0.25, %v709_v30 }
 0x16c   : > { %1136 = vst [vmem:[%s1768_s19 + $0x30] sm:$0xff] %v832_v34  ;;  %v716_v55 = vrot.slane %v501_v21, 1  ;;  %v871_v43 = vrot.slane %v701_v7, 1  ;;  %v713_v6 = vmul.f32 0.5, %v691_v3  ;;  %v875_v18 = vrot.slane %v701_v7, 2 }
 0x16d   : > { %v710_v1 = vadd.f32 %v706_v42, %v692_v10  ;;  %v700_v44 = vadd.f32 %v696_v48, %v690_v41  ;;  %v714_v0 = vmul.f32 0.5, %v692_v10  ;;  %v719_v61 = vadd.f32 %v715_v20, %v1799_v23 }
 0x16e   : > { %v879_v26 = vrot.slane %v701_v7, 3  ;;  %v915_v35 = vsel %vm799_vm1, %v701_v7, %v871_v43  ;;  %v720_v50 = vadd.f32 %v716_v55, %v501_v21  ;;  %v885_v14 = vrot.slane %v711_v32, 4 }
 0x16f   : > { %v702_v33 = vmul.f32 0.25, %v700_v44  ;;  %v712_v25 = vmul.f32 0.25, %v710_v1  ;;  %v917_v38 = vsel %vm802_vm2, %v915_v35, %v875_v18  ;;  %v891_v60 = vrot.slane %v713_v6, 5 }
 0x170   : > { %v919_v62 = vsel %vm805_vm3, %v917_v38, %v879_v26  ;;  %v721_v19 = vmul.f32 0.5, %v719_v61  ;;  %v897_v21 = vrot.slane %v1715_v46, 1  ;;  %v892_v29 = vrot.slane %v714_v0, 5 }
 0x171   : > { %v872_v52 = vrot.slane %v702_v33, 1  ;;  %v876_v15 = vrot.slane %v702_v33, 2  ;;  %v880_v28 = vrot.slane %v702_v33, 3  ;;  %v886_v58 = vrot.slane %v712_v25, 4 }
 0x172   : > { %v921_v4 = vsel %vm808_vm4, %v919_v62, %v885_v14  ;;  %v722_v27 = vmul.f32 0.5, %v720_v50  ;;  %v898_v8 = vrot.slane %v1728_v13, 1 }
 0x173   : > { %v916_v3 = vsel %vm799_vm1, %v702_v33, %v872_v52  ;;  %v923_v37 = vsel %vm508_vm0, %v921_v4, %v891_v60 }
 0x174   : > { %v918_v23 = vsel %vm802_vm2, %v916_v3, %v876_v15  ;;  %v925_v54 = vsel %vm813_vm5, %v923_v37, %v721_v19 }
 0x175   : > { %v920_v56 = vsel %vm805_vm3, %v918_v23, %v880_v28  ;;  %v927_v46 = vsel %vm816_vm6, %v925_v54, %v897_v21 }
 0x176   : > { %v922_v53 = vsel %vm808_vm4, %v920_v56, %v886_v58  ;;  %958 = vst [vmem:[%s1768_s19 + $0x18] sm:$0xff] %v927_v46 }
 0x177   : > { %v924_v11 = vsel %vm508_vm0, %v922_v53, %v892_v29 }
 0x178   : > { %v926_v36 = vsel %vm813_vm5, %v924_v11, %v722_v27 }
 0x179   : > { %v928_v40 = vsel %vm816_vm6, %v926_v36, %v898_v8 }
 0x17a   : > { %1138 = vst [vmem:[%s1768_s19 + $0x40] sm:$0xff] %v928_v40 }
 0x17b   : > { %1370 = shalt.err (!%p1367_p5)
}
 0x17c   : > { %s1371_s3 = scalar_lea.hbm %s1892_s24, 1280  ;;  %s1375_s27 = scalar_lea.hbm %s1948_s2, 2560 }
 0x17d   : > { %p1372_p7 = scmp.ne.s32.totalorder %s1892_s24, %s1371_s3  ;;  %p1376_p9 = scmp.lt.s32.totalorder %s1892_s24, %s1948_s2 }
 0x17e   : > { %p1377_p11 = scmp.lt.s32.totalorder %s1375_s27, %s1371_s3 }
 0x17f   : > { %p1373_p4 = pnand %p1372_p7, %p1555_p13 }
 0x180   : > { %p1378_p10 = por %p1377_p11, %p1376_p9 }
 0x181   : > { %p1374_p6 = pneg %p1373_p4 }
 0x183   : > { %p1379_p1 = pnand %p1378_p10, %p1374_p6 }
 0x185   : > { %1382 = shalt.err (!%p1379_p1)
}
 0x186   : > { %s1448_s17 = smov 128   ;;  %s1449_s19 = smov 8  }
 0x187   : > { %1216 = dma.vmem_to_hbm [thread:$0]  (%p1555_p13), %s1896_s28, 1280, %s1892_s24, %s967_s26, %s1448_s17, %s1448_s17, %s1449_s19  }
 0x188 PF: > { %s996_s21 = sand.u32 1, %s1421_s9   ;;  %p1973_p8 = scmp.ne.s32.totalorder %s1957_s20, 0 }
 0x189   : > { %p1974_p12 = scmp.ge.s32.totalorder %s1441_s14, 2  ;;  %s997_s12 = scalar_lea.sflag [#allocation4], %s996_s21 }
 0x18b   : > { %p1227_p0 = pnand %p1974_p12, %p1973_p8 }
 0x18d   : > { %p1228_p2 = pneg %p1227_p0 }
 0x18f   : > { %1416 = dma.done.wait (%p1228_p2), %s997_s12, 1280  }
 0x190   : > { %1418 = vsyncadd (%p1228_p2), %s997_s12, 4294966016  ;;  %s19_s14 = sadd.s32 1, %s1441_s14   ;;  %s1975_s9 = smov %s1425_s10 }
 0x191   : > { %p16_p3 = scmp.ge.s32.totalorder %s19_s14, 4   ;;  %s1976_s10 = smov %s1429_s11 }
 0x192   : > { %s1977_s11 = smov %s1564_s15  ;;  %s1978_s12 = smov %s1437_s13 }
 0x193   : > { %s1979_s13 = smov %s1981_s25  ;;  %18 = sbr.rel (!%p16_p3) target bundleno = 7 (0x7), region = 79 }
 0x198   :  { %1002 = vsyncpa [#allocation3], 1 }
 0x199   :  { %1004 = vsyncpa [#allocation3 + $0x1], 1 }
 0x19a   :  { %1005 = vsyncpa [#allocation6], 1 }
 0x19b   :  { %1006 = vsyncpa [#allocation4], 1 }
 0x19c   :  { %1008 = vsyncpa [#allocation4 + $0x1], 1 }

</bundles_post_ra>
